<compile_context>
chip_gen: v7x
topology: tpu7x:2x2x1
jax: 0.10.0
libtpu: 0.0.40
codegen_flags: <defaults>
</compile_context>

<pallas_src>
import jax
import jax.numpy as jnp
from jax.experimental import pallas as pl
from jax.experimental.pallas import tpu as pltpu


def _smooth_l1(d):
    # PyTorch nn.SmoothL1Loss default beta=1.0, elementwise term
    ad = jnp.abs(d)
    return jnp.where(ad < 1.0, 0.5 * d * d, ad - 0.5)


def _make_kernel(positive_reg_lb: float):
    lb = float(positive_reg_lb)

    def kernel(pred_ref, target_ref, iou_ref, out_ref, wsum_ref, cnt_ref):
        step = pl.program_id(0)

        @pl.when(step == 0)
        def _init():
            wsum_ref[...] = jnp.zeros_like(wsum_ref)
            cnt_ref[...] = jnp.zeros_like(cnt_ref)

        # Cast in VMEM (VPU op hidden under the DMA); inputs arrive in native dtype.
        pred = pred_ref[...].astype(jnp.float32)    # (7, TILE_N)  lane-dense
        tgt = target_ref[...].astype(jnp.float32)   # (7, TILE_N)
        iou = iou_ref[...].astype(jnp.float32)      # (1, TILE_N)

        pos = (iou >= lb).astype(jnp.float32)       # (1, TILE_N) positive mask

        sl1 = _smooth_l1(pred - tgt)                # (7, TILE_N)

        # Fused weighted reduction (algebraically identical to the 3-group form):
        #   trans/(3c) + 3*size/(3c) + rot/c == (1*trans + 3*size + 3*rot) / (3c)
        # rows 0:3 (x,y,z) -> weight 1 ; rows 3:7 (h,w,l,ry) -> weight 3.
        row = jax.lax.broadcasted_iota(jnp.int32, sl1.shape, 0)
        w = jnp.where(row < 3, 1.0, 3.0)            # (7, TILE_N)

        wsum_ref[...] += jnp.sum(sl1 * w * pos, keepdims=True)   # (1, 1)
        cnt_ref[...] += jnp.sum(pos, keepdims=True)              # (1, 1)

        @pl.when(step == pl.num_programs(0) - 1)
        def _finalize():
            cnt = cnt_ref[...]                      # (1, 1)
            safe = jnp.maximum(cnt, 1.0)
            total = wsum_ref[...] / (3.0 * safe)
            # TODO(synk): PyTorch returns NaN when no positives (mean over an
            # empty selection * 0); the module's intent is a zero loss, so emit 0.
            out_ref[...] = jnp.where(cnt > 0.0, total, 0.0)

    return kernel


def _round_up(x, m):
    return (x + m - 1) // m * m


def regression_loss(pred, target, iou, config, *, tile_n=2048):
    """Pallas equivalent of RegressionLoss.forward. Returns a scalar f32."""
    n = pred.shape[0]
    assert pred.shape == (n, 7) and target.shape == (n, 7) and iou.shape == (n,)

    # Lane-aligned tile; pad N up to a multiple of it.  Padded entries get
    # iou=-inf so the positive mask zeroes them out (and pred=target=0 anyway).
    tile = min(int(tile_n), _round_up(max(n, 1), 128))
    tile = _round_up(tile, 128)
    n_pad = _round_up(n, tile)
    if n_pad != n:
        pad = n_pad - n
        pred = jnp.pad(pred, ((0, pad), (0, 0)))
        target = jnp.pad(target, ((0, pad), (0, 0)))
        iou = jnp.pad(iou, (0, pad), constant_values=-jnp.inf)

    # Lane-dense layout: 7 box params -> sublanes, N -> lanes.
    pred_t = pred.T                 # (7, n_pad)
    target_t = target.T             # (7, n_pad)
    iou2 = iou.reshape(1, n_pad)    # (1, n_pad)

    grid = (n_pad // tile,)
    kernel = _make_kernel(config["positive_reg_lb"])

    out = pl.pallas_call(
        kernel,
        out_shape=jax.ShapeDtypeStruct((1, 1), jnp.float32),
        grid_spec=pltpu.PrefetchScalarGridSpec(
            num_scalar_prefetch=0,
            grid=grid,
            in_specs=[
                pl.BlockSpec((7, tile), lambda i: (0, i)),
                pl.BlockSpec((7, tile), lambda i: (0, i)),
                pl.BlockSpec((1, tile), lambda i: (0, i)),
            ],
            out_specs=pl.BlockSpec((1, 1), lambda i: (0, 0)),
            scratch_shapes=[
                pltpu.VMEM((1, 1), jnp.float32),   # running weighted SmoothL1 sum
                pltpu.VMEM((1, 1), jnp.float32),   # running positive count
            ],
        ),
        compiler_params=pltpu.CompilerParams(
            dimension_semantics=("arbitrary",),    # N is a reduction axis
        ),
    )(pred_t, target_t, iou2)
    return out[0, 0]


def _reference(pred, target, iou, config):
    """Pure-JAX reference mirroring the PyTorch semantics (for verification)."""
    mask = (iou >= config["positive_reg_lb"]).astype(jnp.float32)
    cnt = jnp.sum(mask)
    diff = pred.astype(jnp.float32) - target.astype(jnp.float32)
    sl1 = _smooth_l1(diff) * mask[:, None]
    safe = jnp.maximum(cnt, 1.0)
    lt = jnp.sum(sl1[:, 0:3]) / (3.0 * safe)
    ls = jnp.sum(sl1[:, 3:6]) / (3.0 * safe)
    lr = jnp.sum(sl1[:, 6]) / safe
    return jnp.where(cnt > 0, lt + 3.0 * ls + lr, 0.0)


if __name__ == "__main__":
    config = {"positive_reg_lb": 0.55}

    # Case 1: small proposal count (single grid step).
    N = 64
    k_pred, k_tgt, k_iou = jax.random.split(jax.random.PRNGKey(0), 3)
    pred = jax.random.normal(k_pred, (N, 7), dtype=jnp.float32)
    target = pred + 0.3 * jax.random.normal(k_tgt, (N, 7), dtype=jnp.float32)
    iou = jax.random.uniform(k_iou, (N,), dtype=jnp.float32)  # mix of pos/neg

    loss = jax.block_until_ready(regression_loss(pred, target, iou, config))
    ref = jax.block_until_ready(_reference(pred, target, iou, config))
    assert jnp.allclose(loss, ref, atol=1e-5, rtol=1e-5), (loss, ref)

    # Case 2: multi-step grid (exercises init / accumulate / finalize path).
    N2 = 300
    k_pred2, k_tgt2, k_iou2 = jax.random.split(jax.random.PRNGKey(1), 3)
    pred2 = jax.random.normal(k_pred2, (N2, 7), dtype=jnp.float32)
    target2 = pred2 + 0.3 * jax.random.normal(k_tgt2, (N2, 7), dtype=jnp.float32)
    iou2 = jax.random.uniform(k_iou2, (N2,), dtype=jnp.float32)
    loss2 = jax.block_until_ready(
        regression_loss(pred2, target2, iou2, config, tile_n=128))
    ref2 = jax.block_until_ready(_reference(pred2, target2, iou2, config))
    assert jnp.allclose(loss2, ref2, atol=1e-5, rtol=1e-5), (loss2, ref2)

    # Case 3: no positive samples -> zero loss.
    iou_neg = jnp.zeros((N,), dtype=jnp.float32)
    loss3 = jax.block_until_ready(regression_loss(pred, target, iou_neg, config))
    assert jnp.allclose(loss3, 0.0, atol=1e-6), loss3

    print("KERNEL_OK")
</pallas_src>

<mosaic_0001>
module attributes {stable_mosaic.version = 11 : i64} {
  func.func @kernel(%arg0: i32, %arg1: memref<7x128xf32, #tpu.memory_space<vmem>>, %arg2: memref<7x128xf32, #tpu.memory_space<vmem>>, %arg3: memref<1x128xf32, #tpu.memory_space<vmem>>, %arg4: memref<1x1xf32, #tpu.memory_space<vmem>>, %arg5: memref<1x1xf32, #tpu.memory_space<vmem>>, %arg6: memref<1x1xf32, #tpu.memory_space<vmem>>) attributes {dimension_semantics = [#tpu.dimension_semantics<arbitrary>], iteration_bounds = array<i64: 1>, scalar_prefetch = 0 : i64, scratch_operands = 2 : i64, tpu.core_type = #tpu.core_type<tc>, window_params = [{transform_indices = @transform_0, window_bounds = array<i64: 7, 128>}, {transform_indices = @transform_1, window_bounds = array<i64: 7, 128>}, {transform_indices = @transform_2, window_bounds = array<i64: 1, 128>}, {pipeline_mode = #tpu.pipeline_mode<synchronous>, transform_indices = @transform_3, window_bounds = array<i64: 1, 1>}]} {
    %c0_i32 = arith.constant 0 : i32
    %0 = arith.cmpi eq, %arg0, %c0_i32 : i32
    %1 = arith.extui %0 : i1 to i32
    %c0_i32_0 = arith.constant 0 : i32
    %2 = arith.cmpi ne, %1, %c0_i32_0 : i32
    scf.if %2 {
      %cst_23 = arith.constant 0.000000e+00 : f32
      %48 = vector.broadcast %cst_23 : f32 to vector<1x1xf32>
      %c0_24 = arith.constant 0 : index
      %c0_25 = arith.constant 0 : index
      %49 = vector.load %arg5[%c0_24, %c0_25] : memref<1x1xf32, #tpu.memory_space<vmem>>, vector<1x1xf32>
      tpu.vector_store %arg5[%c0_24, %c0_25], %48 {strides = array<i32>} : memref<1x1xf32, #tpu.memory_space<vmem>>, vector<1x1xf32>,
      %cst_26 = arith.constant 0.000000e+00 : f32
      %50 = vector.broadcast %cst_26 : f32 to vector<1x1xf32>
      %c0_27 = arith.constant 0 : index
      %c0_28 = arith.constant 0 : index
      %51 = vector.load %arg6[%c0_27, %c0_28] : memref<1x1xf32, #tpu.memory_space<vmem>>, vector<1x1xf32>
      tpu.vector_store %arg6[%c0_27, %c0_28], %50 {strides = array<i32>} : memref<1x1xf32, #tpu.memory_space<vmem>>, vector<1x1xf32>,
    } else {
    }
    %c0 = arith.constant 0 : index
    %c0_1 = arith.constant 0 : index
    %3 = vector.load %arg1[%c0, %c0_1] : memref<7x128xf32, #tpu.memory_space<vmem>>, vector<7x128xf32>
    %c0_2 = arith.constant 0 : index
    %c0_3 = arith.constant 0 : index
    %4 = vector.load %arg2[%c0_2, %c0_3] : memref<7x128xf32, #tpu.memory_space<vmem>>, vector<7x128xf32>
    %c0_4 = arith.constant 0 : index
    %c0_5 = arith.constant 0 : index
    %5 = vector.load %arg3[%c0_4, %c0_5] : memref<1x128xf32, #tpu.memory_space<vmem>>, vector<1x128xf32>
    %cst = arith.constant 5.500000e-01 : f32
    %6 = vector.broadcast %cst : f32 to vector<1x128xf32>
    %7 = arith.cmpf oge, %5, %6 : vector<1x128xf32>
    %8 = arith.extui %7 : vector<1x128xi1> to vector<1x128xi32>
    %9 = arith.sitofp %8 : vector<1x128xi32> to vector<1x128xf32>
    %10 = arith.subf %3, %4 : vector<7x128xf32>
    %11 = math.absf %10 : vector<7x128xf32>
    %cst_6 = arith.constant 1.000000e+00 : f32
    %12 = vector.broadcast %cst_6 : f32 to vector<7x128xf32>
    %13 = arith.cmpf olt, %11, %12 : vector<7x128xf32>
    %cst_7 = arith.constant 5.000000e-01 : f32
    %14 = vector.broadcast %cst_7 : f32 to vector<7x128xf32>
    %15 = arith.mulf %14, %10 : vector<7x128xf32>
    %16 = arith.mulf %15, %10 : vector<7x128xf32>
    %cst_8 = arith.constant 5.000000e-01 : f32
    %17 = vector.broadcast %cst_8 : f32 to vector<7x128xf32>
    %18 = arith.subf %11, %17 : vector<7x128xf32>
    %19 = arith.select %13, %16, %18 : vector<7x128xi1>, vector<7x128xf32>
    %20 = tpu.iota {dimensions = array<i32: 0>} : vector<7x128xi32>
    %c3_i32 = arith.constant 3 : i32
    %21 = vector.broadcast %c3_i32 : i32 to vector<7x128xi32>
    %22 = arith.cmpi slt, %20, %21 : vector<7x128xi32>
    %cst_9 = arith.constant 1.000000e+00 : f32
    %cst_10 = arith.constant 3.000000e+00 : f32
    %23 = vector.broadcast %cst_9 : f32 to vector<7x128xf32>
    %24 = vector.broadcast %cst_10 : f32 to vector<7x128xf32>
    %25 = arith.select %22, %23, %24 : vector<7x128xi1>, vector<7x128xf32>
    %c0_11 = arith.constant 0 : index
    %c0_12 = arith.constant 0 : index
    %26 = vector.load %arg5[%c0_11, %c0_12] : memref<1x1xf32, #tpu.memory_space<vmem>>, vector<1x1xf32>
    %27 = arith.mulf %19, %25 : vector<7x128xf32>
    %28 = vector.broadcast %9 : vector<1x128xf32> to vector<7x128xf32>
    %29 = arith.mulf %27, %28 : vector<7x128xf32>
    %30 = vector.shape_cast %29 : vector<7x128xf32> to vector<1x7x128xf32>
    %cst_13 = arith.constant dense<0.000000e+00> : vector<1xf32>
    %31 = vector.multi_reduction <add>, %30, %cst_13 [1, 2] : vector<1x7x128xf32> to vector<1xf32>
    %32 = vector.shape_cast %31 : vector<1xf32> to vector<1x1x1xf32>
    %33 = vector.extract %32[0, 0, 0] : f32 from vector<1x1x1xf32>
    %34 = vector.broadcast %33 : f32 to vector<1x1xf32>
    %35 = arith.addf %26, %34 : vector<1x1xf32>
    %c0_14 = arith.constant 0 : index
    %c0_15 = arith.constant 0 : index
    %36 = vector.load %arg5[%c0_14, %c0_15] : memref<1x1xf32, #tpu.memory_space<vmem>>, vector<1x1xf32>
    tpu.vector_store %arg5[%c0_14, %c0_15], %35 {strides = array<i32>} : memref<1x1xf32, #tpu.memory_space<vmem>>, vector<1x1xf32>,
    %c0_16 = arith.constant 0 : index
    %c0_17 = arith.constant 0 : index
    %37 = vector.load %arg6[%c0_16, %c0_17] : memref<1x1xf32, #tpu.memory_space<vmem>>, vector<1x1xf32>
    %38 = vector.shape_cast %9 : vector<1x128xf32> to vector<1x1x128xf32>
    %cst_18 = arith.constant dense<0.000000e+00> : vector<1xf32>
    %39 = vector.multi_reduction <add>, %38, %cst_18 [1, 2] : vector<1x1x128xf32> to vector<1xf32>
    %40 = vector.shape_cast %39 : vector<1xf32> to vector<1x1x1xf32>
    %41 = vector.extract %40[0, 0, 0] : f32 from vector<1x1x1xf32>
    %42 = vector.broadcast %41 : f32 to vector<1x1xf32>
    %43 = arith.addf %37, %42 : vector<1x1xf32>
    %c0_19 = arith.constant 0 : index
    %c0_20 = arith.constant 0 : index
    %44 = vector.load %arg6[%c0_19, %c0_20] : memref<1x1xf32, #tpu.memory_space<vmem>>, vector<1x1xf32>
    tpu.vector_store %arg6[%c0_19, %c0_20], %43 {strides = array<i32>} : memref<1x1xf32, #tpu.memory_space<vmem>>, vector<1x1xf32>,
    %c0_i32_21 = arith.constant 0 : i32
    %45 = arith.cmpi eq, %arg0, %c0_i32_21 : i32
    %46 = arith.extui %45 : i1 to i32
    %c0_i32_22 = arith.constant 0 : i32
    %47 = arith.cmpi ne, %46, %c0_i32_22 : i32
    scf.if %47 {
      %c0_23 = arith.constant 0 : index
      %c0_24 = arith.constant 0 : index
      %48 = vector.load %arg6[%c0_23, %c0_24] : memref<1x1xf32, #tpu.memory_space<vmem>>, vector<1x1xf32>
      %cst_25 = arith.constant 1.000000e+00 : f32
      %49 = vector.broadcast %cst_25 : f32 to vector<1x1xf32>
      %50 = arith.maximumf %48, %49 : vector<1x1xf32>
      %c0_26 = arith.constant 0 : index
      %c0_27 = arith.constant 0 : index
      %51 = vector.load %arg5[%c0_26, %c0_27] : memref<1x1xf32, #tpu.memory_space<vmem>>, vector<1x1xf32>
      %cst_28 = arith.constant 3.000000e+00 : f32
      %52 = vector.broadcast %cst_28 : f32 to vector<1x1xf32>
      %53 = arith.mulf %52, %50 : vector<1x1xf32>
      %54 = arith.divf %51, %53 : vector<1x1xf32>
      %cst_29 = arith.constant 0.000000e+00 : f32
      %55 = vector.broadcast %cst_29 : f32 to vector<1x1xf32>
      %56 = arith.cmpf ogt, %48, %55 : vector<1x1xf32>
      %cst_30 = arith.constant 0.000000e+00 : f32
      %57 = vector.broadcast %cst_30 : f32 to vector<1x1xf32>
      %58 = arith.select %56, %54, %57 : vector<1x1xi1>, vector<1x1xf32>
      %c0_31 = arith.constant 0 : index
      %c0_32 = arith.constant 0 : index
      %59 = vector.load %arg4[%c0_31, %c0_32] : memref<1x1xf32, #tpu.memory_space<vmem>>, vector<1x1xf32>
      tpu.vector_store %arg4[%c0_31, %c0_32], %58 {strides = array<i32>} : memref<1x1xf32, #tpu.memory_space<vmem>>, vector<1x1xf32>,
    } else {
    }
    return
  }
  func.func @transform_0(%arg0: i32) -> (i32, i32) {
    %c0_i32 = arith.constant 0 : i32
    %c0_i32_0 = arith.constant 0 : i32
    return %c0_i32, %arg0 : i32, i32
  }
  func.func @transform_1(%arg0: i32) -> (i32, i32) {
    %c0_i32 = arith.constant 0 : i32
    %c0_i32_0 = arith.constant 0 : i32
    return %c0_i32, %arg0 : i32, i32
  }
  func.func @transform_2(%arg0: i32) -> (i32, i32) {
    %c0_i32 = arith.constant 0 : i32
    %c0_i32_0 = arith.constant 0 : i32
    return %c0_i32, %arg0 : i32, i32
  }
  func.func @transform_3(%arg0: i32) -> (i32, i32) {
    %c0_i32 = arith.constant 0 : i32
    %c0_i32_0 = arith.constant 0 : i32
    %c0_i32_1 = arith.constant 0 : i32
    return %c0_i32, %c0_i32_0 : i32, i32
  }
}

</mosaic_0001>

<bundles_post_ra>
// kernel: tpu_custom_call.1
= control target key start
LH: loop header
LB: loop body
LE: loop exit
PB: predicated region body
PF: predicated region fallthrough
CT: control target
= control target key end

     0   :  { %8 = vsyncpa [#allocation5], 0  ;;  %s284_s0 = inlined_call_operand.hbm [shape: f32[7,128], index: 0, kind: input, shape index: {}]   ;;  %s285_s1 = inlined_call_operand.hbm [shape: f32[7,128], index: 1, kind: input, shape index: {}]   ;;  %s286_s2 = inlined_call_operand.vmem [shape: f32[1,128], index: 2, kind: input, shape index: {}]   ;;  %s287_s3 = inlined_call_operand.hbm [shape: f32[1,1], index: 3, kind: output, shape index: {}]  }
   0x1   :  { %9 = vsyncpa [#allocation8], 0 }
   0x2   :  { %10 = vsyncpa [#allocation6], 0  ;;  %s215_s12 = smov [#allocation4]   ;;  %s216_s14 = smov [#allocation7]  }
   0x3   :  { %s17_s13 = sshll.u32 %s215_s12, 4  ;;  %s27_s15 = sshll.u32 %s216_s14, 4  ;;  %s18_s13 = int_to_ptr.vmem [resolvable:$true] %s17_s13  ;;  %s28_s15 = int_to_ptr.vmem [resolvable:$true] %s27_s15 }
   0x4   :  { %s143_s18 = scalar_lea.hbm %s284_s0, 128 }
   0x5   :  { %p144_p0 = scmp.ne.s32.totalorder %s284_s0, %s143_s18  ;;  %p147_p1 = scmp.lt.u32.totalorder %s143_s18, %s284_s0 }
   0x7   :  { %p149_p2 = pnand %p147_p1, %p144_p0 }
   0x9   :  { %152 = shalt.err (!%p149_p2)
}
   0xa   :  { %s153_s23 = scalar_lea.vmem %s18_s13, 128  ;;  %p158_p4 = scmp.lt.s32.totalorder %s18_s13, %s18_s13 }
   0xb   :  { %p154_p3 = scmp.ne.s32.totalorder %s18_s13, %s153_s23  ;;  %p159_p5 = scmp.lt.s32.totalorder %s153_s23, %s153_s23 }
   0xd   :  { %p160_p6 = por %p159_p5, %p158_p4 }
   0xf   :  { %p161_p7 = pnand %p160_p6, %p154_p3 }
  0x11   :  { %164 = shalt.err (!%p161_p7)
}
  0x12   :  { %20 = dma.hbm_to_vmem [thread:$0]  %s284_s0, 128, %s18_s13, [#allocation5]  }
  0x13   :  { %s165_s28 = scalar_lea.hbm %s285_s1, 128 }
  0x14   :  { %p166_p8 = scmp.ne.s32.totalorder %s285_s1, %s165_s28  ;;  %p169_p9 = scmp.lt.u32.totalorder %s165_s28, %s285_s1 }
  0x16   :  { %p171_p10 = pnand %p169_p9, %p166_p8 }
  0x18   :  { %174 = shalt.err (!%p171_p10)
}
  0x19   :  { %s175_s6 = scalar_lea.vmem %s28_s15, 128  ;;  %p180_p12 = scmp.lt.s32.totalorder %s28_s15, %s28_s15 }
  0x1a   :  { %p176_p11 = scmp.ne.s32.totalorder %s28_s15, %s175_s6  ;;  %p181_p13 = scmp.lt.s32.totalorder %s175_s6, %s175_s6 }
  0x1c   :  { %p182_p0 = por %p181_p13, %p180_p12 }
  0x1e   :  { %p183_p1 = pnand %p182_p0, %p176_p11 }
  0x20   :  { %186 = shalt.err (!%p183_p1)
}
  0x21   :  { %30 = dma.hbm_to_vmem [thread:$0]  %s285_s1, 128, %s28_s15, [#allocation8]  }
  0x22   :  { %209 = dma.done.wait [#allocation5], 128  }
  0x23   :  { %210 = vsyncadd [#allocation5], 4294967168 }
  0x24   :  { %211 = dma.done.wait [#allocation8], 128  }
  0x25   :  { %212 = vsyncadd [#allocation8], 4294967168  ;;  %v59_v0 = vlaneseq  ;;  %v46_v2 = vld [vmem:[#allocation4] sm:$0x7f]  ;;  %v47_v3 = vld [vmem:[#allocation7] sm:$0x7f] }
  0x26   :  { %v48_v4 = vld [vmem:[%s286_s2] sm:$0x1]  ;;  %v52_v5 = vsub.f32 %v46_v2, %v47_v3  ;;  %v217_v7 = vmov 0.0   ;;  %v218_v13 = vmov 3.0   ;;  %vm72_vm3 = vcmask 1046528   ;;  %s219_s10 = smov [#allocation9]  }
  0x27   :  { %v60_v1 = vshrl.u32 %v59_v0, 7  ;;  %vm49_vm0 = vcmp.ge.f32.partialorder %v48_v4, 0.55  ;;  %vm88_vm4 = vcmask 1040384   ;;  %vm43_vm5 = vcmask 0   ;;  %s120_s11 = sshll.u32 %s219_s10, 4  ;;  %s121_s11 = int_to_ptr.vmem [resolvable:$true] %s120_s11 }
  0x28   :  { %v130_v8 = vsel %vm49_vm0, 1.0, %v217_v7  ;;  %v53_v9 = vand.u32 2147483647, %v52_v5  ;;  %v55_v10 = vmul.f32 0.5, %v52_v5  ;;  %44 = vst.msk [vmem:[#allocation2] sm:$0x1] %vm43_vm5, %v217_v7  ;;  %p192_p3 = scmp.lt.s32.totalorder %s121_s11, %s121_s11 }
  0x29   :  { %vm61_vm1 = vcmp.lt.s32.totalorder %v60_v1, 3  ;;  %v68_v6 = vsub.s32 0, %v60_v1  ;;  %v89_v20 = vsel %vm88_vm4, %v130_v8, 0.0  ;;  %45 = vst.msk [vmem:[#allocation3] sm:$0x1] %vm43_vm5, %v217_v7  ;;  %s187_s12 = scalar_lea.vmem %s121_s11, 16 }
  0x2a   :  { %vm54_vm2 = vcmp.lt.f32.partialorder %v53_v9, 1.0  ;;  %v56_v11 = vmul.f32 %v55_v10, %v52_v5  ;;  %v131_v12 = vadd.f32 -0.5, %v53_v9  ;;  %v62_v14 = vsel %vm61_vm1, 1.0, %v218_v13  ;;  %p188_p2 = scmp.ne.s32.totalorder %s121_s11, %s187_s12  ;;  %s191_s13 = scalar_lea.vmem %s121_s11, 32 }
  0x2b   :  { %v69_v15 = vrot.slane %v130_v8, %v68_v6  ;;  %p193_p4 = scmp.lt.s32.totalorder %s191_s13, %s187_s12 }
  0x2c   :  { %v58_v16 = vsel %vm54_vm2, %v56_v11, %v131_v12 }
  0x2d   :  { %v64_v17 = vmul.f32 %v62_v14, %v58_v16  ;;  %p194_p5 = por %p193_p4, %p192_p3 }
  0x2f   :  { %v71_v18 = vmul.f32 %v69_v15, %v64_v17  ;;  %v63_v35 = vld [vmem:[#allocation2] sm:$0x1]  ;;  %p195_p6 = pnand %p194_p5, %p188_p2 }
  0x30   :  { %v87_v38 = vld [vmem:[#allocation3] sm:$0x1] }
  0x31   :  { %v73_v19 = vsel %vm72_vm3, %v71_v18, 0.0 }
  0x32   :  { %74 = vadd.xlane.f32.xlu0 %v73_v19 }
  0x36   :  { %90 = vadd.xlane.f32.xlu0 %v89_v20 }
  0xbf   :  { %v75_v21 = vpop.xlane.xlu0 %74 }
  0xc0   :  { %v76_v22 = vrot.slane %v75_v21, 4 }
  0xc2   :  { %v77_v23 = vadd.f32 %v76_v22, %v75_v21 }
  0xc3   :  { %v91_v24 = vpop.xlane.xlu0 %90 }
  0xc4   :  { %v78_v25 = vrot.slane %v77_v23, 2  ;;  %v92_v26 = vrot.slane %v91_v24, 4 }
  0xc6   :  { %v93_v27 = vadd.f32 %v92_v26, %v91_v24  ;;  %v79_v28 = vadd.f32 %v78_v25, %v77_v23 }
  0xc8   :  { %v94_v29 = vrot.slane %v93_v27, 2  ;;  %v80_v30 = vrot.slane %v79_v28, 1 }
  0xca   :  { %v95_v31 = vadd.f32 %v94_v29, %v93_v27  ;;  %v81_v32 = vadd.f32 %v80_v30, %v79_v28 }
  0xcc   :  { %132 = vpush %v81_v32  ;;  %v96_v33 = vrot.slane %v95_v31, 1 }
  0xce   :  { %v97_v34 = vadd.f32 %v96_v33, %v95_v31 }
  0xd0   :  { %134 = vpush %v97_v34 }
  0xfd   :  { %s133_s1 = spop %132 }
  0xfe   :  { %v83_v36 = vstv %s133_s1 }
  0xff   :  { %v84_v37 = vadd.f32 %v83_v36, %v63_v35 }
 0x101   :  { %86 = vst.msk [vmem:[#allocation2] sm:$0x1] %vm43_vm5, %v84_v37  ;;  %s135_s2 = spop %134 }
 0x102   :  { %v99_v39 = vstv %s135_s2 }
 0x103   :  { %v100_v40 = vadd.f32 %v99_v39, %v87_v38 }
 0x105   :  { %101 = vst.msk [vmem:[#allocation3] sm:$0x1] %vm43_vm5, %v100_v40 }
 0x108   :  { %v107_v45 = vld [vmem:[#allocation2] sm:$0x1] }
 0x10c   :  { %v105_v41 = vld [vmem:[#allocation3] sm:$0x1] }
 0x10d   :  { %v106_v42 = vmax.f32 %v105_v41, 1.0  ;;  %vm111_vm6 = vcmp.gt.f32.partialorder %v105_v41, 0.0 }
 0x10f   :  { %v108_v43 = vmul.f32 3.0, %v106_v42 }
 0x111   :  { %141 = vrcp.f32 %v108_v43 }
 0x11b   :  { %v142_v44 = vpop.eup %141 }
 0x11c   :  { %v110_v46 = vmul.f32 %v142_v44, %v107_v45 }
 0x11e   :  { %v112_v47 = vsel %vm111_vm6, %v110_v46, 0.0 }
 0x11f   :  { %113 = vst.msk [vmem:[#allocation9] sm:$0x1] %vm43_vm5, %v112_v47 }
 0x120   :  { %198 = shalt.err (!%p195_p6)
}
 0x121   :  { %s199_s16 = scalar_lea.hbm %s287_s3, 16 }
 0x122   :  { %p200_p7 = scmp.ne.s32.totalorder %s287_s3, %s199_s16  ;;  %p203_p8 = scmp.lt.u32.totalorder %s199_s16, %s287_s3 }
 0x124   :  { %p205_p9 = pnand %p203_p8, %p200_p7 }
 0x126   :  { %208 = shalt.err (!%p205_p9)
}
 0x127   :  { %123 = dma.vmem_to_hbm [thread:$0]  %s121_s11, 16, %s287_s3, [#allocation6]  }
 0x128   :  { %213 = dma.done.wait [#allocation6], 16  }
 0x129   :  { %214 = vsyncadd [#allocation6], 4294967280 }
 0x12a   :  { %127 = vsyncpa [#allocation5], 1 }
 0x12b   :  { %128 = vsyncpa [#allocation8], 1 }
 0x12c   :  { %129 = vsyncpa [#allocation6], 1 }

</bundles_post_ra>
